<compile_context>
chip_gen: v5e
topology: v5e:2x2
jax: 0.10.0
libtpu: 0.0.40
codegen_flags: <defaults>
</compile_context>

<pallas_src>
import jax
import jax.numpy as jnp
import numpy as np
from jax.experimental import pallas as pl
from jax.experimental.pallas import tpu as pltpu

N_HS, B, L, H = 5, 2, 8, 32     # num hidden states, batch, seq, hidden


def dense_head_kernel(x_ref, w_ref, b_ref, out_ref):
    # x_ref : (B, N*L, H) stacked hidden states, channels on the lane dim
    # w_ref : (1, H)      fc weight
    # b_ref : (1, 1)      fc bias
    # out_ref: (B, 1)
    x = x_ref[...]
    inv_nl = 1.0 / x_ref.shape[1]
    # mean over layers & tokens (sublane reduction), then fused Linear(H, 1):
    pooled = jnp.sum(x, axis=1) * inv_nl                             # (B, H)
    out_ref[...] = (jnp.sum(pooled * w_ref[...], axis=1, keepdims=True)
                    + b_ref[...])                                    # (B, 1)


def dense_head(hs_stack, fc_w, fc_b):
    """hs_stack: (N, B, L, H) stacked hidden states; fc_w: (1, H); fc_b: (1,)."""
    n, bn, ln, hn = hs_stack.shape
    nl = n * ln
    # wrapper-side layout plumbing: (N, B, L, H) -> (B, N*L, H)
    x = jnp.transpose(hs_stack, (1, 0, 2, 3)).reshape(bn, nl, hn)
    w = fc_w.reshape(1, hn)
    b = fc_b.reshape(1, 1)

    out = pl.pallas_call(
        dense_head_kernel,
        out_shape=jax.ShapeDtypeStruct((bn, 1), jnp.float32),
        grid_spec=pltpu.PrefetchScalarGridSpec(
            num_scalar_prefetch=0,
            grid=(1,),                                  # batch folded into one step
            in_specs=[
                pl.BlockSpec((bn, nl, hn), lambda i: (0, 0, 0)),  # hidden states
                pl.BlockSpec((1, hn), lambda i: (0, 0)),          # fc weight
                pl.BlockSpec((1, 1), lambda i: (0, 0)),           # fc bias
            ],
            out_specs=pl.BlockSpec((bn, 1), lambda i: (0, 0)),
        ),
        compiler_params=pltpu.CompilerParams(dimension_semantics=("arbitrary",)),
    )(x, w, b)
    return out


def ref_forward(hs_stack, fc_w, fc_b):
    """Pure-JAX reference matching the PyTorch forward."""
    pooled = jnp.mean(hs_stack, axis=(0, 2))            # (B, H)
    return pooled @ fc_w.T + fc_b[None, :]              # (B, 1)


if __name__ == "__main__":
    key = jax.random.PRNGKey(0)
    k1, k2, k3 = jax.random.split(key, 3)

    # synthetic roberta hidden states, stacked like torch.stack(hs)
    hs_stack = jax.random.normal(k1, (N_HS, B, L, H), jnp.float32)

    # fc parameters in PyTorch Linear layout: weight (out=1, in=H), bias (1,)
    fc_w = jax.random.normal(k2, (1, H), jnp.float32) * 0.02
    fc_b = jax.random.normal(k3, (1,), jnp.float32) * 0.02

    out = jax.block_until_ready(dense_head(hs_stack, fc_w, fc_b))

    ref = ref_forward(hs_stack, fc_w, fc_b)
    np.testing.assert_allclose(np.asarray(out), np.asarray(ref), rtol=1e-4, atol=1e-4)

    print("KERNEL_OK")
</pallas_src>

<mosaic_0001>
module attributes {stable_mosaic.version = 11 : i64} {
  func.func @dense_head_kernel(%arg0: i32, %arg1: memref<2x40x32xf32, #tpu.memory_space<vmem>>, %arg2: memref<1x32xf32, #tpu.memory_space<vmem>>, %arg3: memref<1x1xf32, #tpu.memory_space<vmem>>, %arg4: memref<2x1xf32, #tpu.memory_space<vmem>>) attributes {dimension_semantics = [#tpu.dimension_semantics<arbitrary>], iteration_bounds = array<i64: 1>, scalar_prefetch = 0 : i64, scratch_operands = 0 : i64, tpu.core_type = #tpu.core_type<tc>, window_params = [{pipeline_mode = #tpu.pipeline_mode<synchronous>, transform_indices = @transform_0, window_bounds = array<i64: 2, 40, 32>}, {pipeline_mode = #tpu.pipeline_mode<synchronous>, transform_indices = @transform_1, window_bounds = array<i64: 1, 32>}, {pipeline_mode = #tpu.pipeline_mode<synchronous>, transform_indices = @transform_2, window_bounds = array<i64: 1, 1>}, {pipeline_mode = #tpu.pipeline_mode<synchronous>, transform_indices = @transform_3, window_bounds = array<i64: 2, 1>}]} {
    %c0 = arith.constant 0 : index
    %c0_0 = arith.constant 0 : index
    %c0_1 = arith.constant 0 : index
    %0 = vector.load %arg1[%c0, %c0_0, %c0_1] : memref<2x40x32xf32, #tpu.memory_space<vmem>>, vector<2x40x32xf32>
    %cst = arith.constant dense<0.000000e+00> : vector<2x32xf32>
    %1 = vector.multi_reduction <add>, %0, %cst [1] : vector<2x40x32xf32> to vector<2x32xf32>
    %cst_2 = arith.constant 2.500000e-02 : f32
    %2 = vector.broadcast %cst_2 : f32 to vector<2x32xf32>
    %3 = arith.mulf %1, %2 : vector<2x32xf32>
    %c0_3 = arith.constant 0 : index
    %c0_4 = arith.constant 0 : index
    %4 = vector.load %arg2[%c0_3, %c0_4] : memref<1x32xf32, #tpu.memory_space<vmem>>, vector<1x32xf32>
    %5 = vector.broadcast %4 : vector<1x32xf32> to vector<2x32xf32>
    %6 = arith.mulf %3, %5 : vector<2x32xf32>
    %cst_5 = arith.constant dense<0.000000e+00> : vector<2xf32>
    %7 = vector.multi_reduction <add>, %6, %cst_5 [1] : vector<2x32xf32> to vector<2xf32>
    %8 = vector.shape_cast %7 : vector<2xf32> to vector<2x1xf32>
    %c0_6 = arith.constant 0 : index
    %c0_7 = arith.constant 0 : index
    %9 = vector.load %arg3[%c0_6, %c0_7] : memref<1x1xf32, #tpu.memory_space<vmem>>, vector<1x1xf32>
    %10 = vector.broadcast %9 : vector<1x1xf32> to vector<2x1xf32>
    %11 = arith.addf %8, %10 : vector<2x1xf32>
    %c0_8 = arith.constant 0 : index
    %c0_9 = arith.constant 0 : index
    %12 = vector.load %arg4[%c0_8, %c0_9] : memref<2x1xf32, #tpu.memory_space<vmem>>, vector<2x1xf32>
    tpu.vector_store %arg4[%c0_8, %c0_9], %11 {strides = array<i32>} : memref<2x1xf32, #tpu.memory_space<vmem>>, vector<2x1xf32>,
    return
  }
  func.func @transform_0(%arg0: i32) -> (i32, i32, i32) {
    %c0_i32 = arith.constant 0 : i32
    %c0_i32_0 = arith.constant 0 : i32
    %c0_i32_1 = arith.constant 0 : i32
    %c0_i32_2 = arith.constant 0 : i32
    return %c0_i32, %c0_i32_0, %c0_i32_1 : i32, i32, i32
  }
  func.func @transform_1(%arg0: i32) -> (i32, i32) {
    %c0_i32 = arith.constant 0 : i32
    %c0_i32_0 = arith.constant 0 : i32
    %c0_i32_1 = arith.constant 0 : i32
    return %c0_i32, %c0_i32_0 : i32, i32
  }
  func.func @transform_2(%arg0: i32) -> (i32, i32) {
    %c0_i32 = arith.constant 0 : i32
    %c0_i32_0 = arith.constant 0 : i32
    %c0_i32_1 = arith.constant 0 : i32
    return %c0_i32, %c0_i32_0 : i32, i32
  }
  func.func @transform_3(%arg0: i32) -> (i32, i32) {
    %c0_i32 = arith.constant 0 : i32
    %c0_i32_0 = arith.constant 0 : i32
    %c0_i32_1 = arith.constant 0 : i32
    return %c0_i32, %c0_i32_0 : i32, i32
  }
}

</mosaic_0001>

<bundles_post_ra>
// kernel: tpu_custom_call.1
= control target key start
LH: loop header
LB: loop body
LE: loop exit
PB: predicated region body
PF: predicated region fallthrough
CT: control target
= control target key end

     0   :  { %vm26_vm0 = vcmask 261120   ;;  %vm68_vm1 = vcmask 1041409   ;;  %vm71_vm2 = vcmask 254976   ;;  %vm80_vm3 = vcmask 1024   ;;  %s157_s0 = inlined_call_operand.vmem [shape: f32[2,40,32], index: 0, kind: input, shape index: {}]   ;;  %s158_s2 = inlined_call_operand.<no memory space> [shape: f32[1,1], index: 2, kind: input, shape index: {}]   ;;  %s159_s1 = inlined_call_operand.vmem [shape: f32[1,32], index: 1, kind: input, shape index: {}]   ;;  %s160_s3 = inlined_call_operand.vmem [shape: f32[2,1], index: 3, kind: output, shape index: {}]  }
   0x1   :  { %v16_v0 = vld [vmem:[%s157_s0] sm:$0xff]  ;;  %v17_v1 = vld [vmem:[%s157_s0 + $0x8] sm:$0xff]  ;;  %v18_v2 = vld [vmem:[%s157_s0 + $0x10] sm:$0xff]  ;;  %v8_v9 = vstv %s158_s2 }
   0x2   :  { %v19_v3 = vld [vmem:[%s157_s0 + $0x18] sm:$0xff]  ;;  %v20_v4 = vld [vmem:[%s157_s0 + $0x20] sm:$0xff]  ;;  %v21_v5 = vld [vmem:[%s157_s0 + $0x28] sm:$0xff]  ;;  %v27_v6 = vsel %vm26_vm0, %v16_v0, 0.0  ;;  %v28_v7 = vsel %vm26_vm0, %v17_v1, 0.0  ;;  %v30_v8 = vsel %vm26_vm0, %v18_v2, 0.0 }
   0x3   :  { %v22_v10 = vld [vmem:[%s157_s0 + $0x30] sm:$0xff]  ;;  %v23_v11 = vld [vmem:[%s157_s0 + $0x38] sm:$0xff]  ;;  %v24_v12 = vld [vmem:[%s157_s0 + $0x40] sm:$0xff]  ;;  %v29_v13 = vadd.f32 %v28_v7, %v27_v6  ;;  %v42_v14 = vsel %vm26_vm0, %v21_v5, 0.0  ;;  %v32_v15 = vsel %vm26_vm0, %v19_v3, 0.0  ;;  %v34_v21 = vsel %vm26_vm0, %v20_v4, 0.0 }
   0x4   :  { %v43_v16 = vsel %vm26_vm0, %v22_v10, 0.0  ;;  %v45_v17 = vsel %vm26_vm0, %v23_v11, 0.0  ;;  %v25_v18 = vld [vmem:[%s157_s0 + $0x48] sm:$0xff]  ;;  %9 = vst [vmem:[#allocation2] sm:$0x1] %v8_v9  ;;  %v47_v22 = vsel %vm26_vm0, %v24_v12, 0.0 }
   0x5   :  { %v31_v19 = vadd.f32 %v30_v8, %v29_v13  ;;  %v44_v20 = vadd.f32 %v43_v16, %v42_v14  ;;  %v49_v25 = vsel %vm26_vm0, %v25_v18, 0.0  ;;  %v86_v42 = vld [vmem:[%s159_s1] ss:$0 sm:$0xff] }
   0x7   :  { %v33_v23 = vadd.f32 %v32_v15, %v31_v19  ;;  %v46_v24 = vadd.f32 %v45_v17, %v44_v20 }
   0x9   :  { %v35_v26 = vadd.f32 %v34_v21, %v33_v23  ;;  %v48_v27 = vadd.f32 %v47_v22, %v46_v24 }
   0xb   :  { %v36_v28 = vrot.slane %v35_v26, 4  ;;  %v50_v29 = vadd.f32 %v49_v25, %v48_v27  ;;  %v87_v49 = vld [vmem:[#allocation2] ss:$0 sm:$0xff] }
   0xd   :  { %v37_v30 = vadd.f32 %v36_v28, %v35_v26  ;;  %v51_v31 = vrot.slane %v50_v29, 4 }
   0xf   :  { %v38_v32 = vrot.slane %v37_v30, 2  ;;  %v52_v33 = vadd.f32 %v51_v31, %v50_v29 }
  0x11   :  { %v39_v34 = vadd.f32 %v38_v32, %v37_v30  ;;  %v53_v35 = vrot.slane %v52_v33, 2 }
  0x13   :  { %v40_v36 = vrot.slane %v39_v34, 1  ;;  %v54_v37 = vadd.f32 %v53_v35, %v52_v33 }
  0x15   :  { %v41_v38 = vadd.f32 %v40_v36, %v39_v34  ;;  %v55_v39 = vrot.slane %v54_v37, 1 }
  0x17   :  { %v56_v40 = vadd.f32 %v55_v39, %v54_v37  ;;  %v57_v41 = vmul.f32 0.025, %v41_v38 }
  0x19   :  { %v58_v43 = vmul.f32 0.025, %v56_v40  ;;  %v63_v44 = vmul.f32 %v86_v42, %v57_v41 }
  0x1b   :  { %v64_v45 = vmul.f32 %v86_v42, %v58_v43 }
  0x1d   :  { %v67_v46 = vrot.slane %v64_v45, 7 }
  0x1f   :  { %v69_v47 = vsel %vm68_vm1, %v67_v46, %v63_v44 }
  0x20   :  { %v72_v48 = vsel %vm71_vm2, %v69_v47, 0.0 }
  0x21   :  { %73 = vadd.xlane.f32.xlu0 %v72_v48 }
  0x94   :  { %v74_v50 = vpop.xlane.xlu0 %73 }
  0x95   :  { %v79_v51 = vadd.f32 %v87_v49, %v74_v50 }
  0x97   :  { %81 = vst.msk [vmem:[%s160_s3] sm:$0x3] %vm80_vm3, %v79_v51 }

</bundles_post_ra>
